<compile_context>
chip_gen: v6e
topology: v6e:2x2x1
jax: 0.10.0
libtpu: 0.0.40
codegen_flags: <defaults>
</compile_context>

<pallas_src>
import jax
import jax.numpy as jnp
from jax.experimental import pallas as pl
from jax.experimental.pallas import tpu as pltpu


def _make_kernel(N, H, W, Cin, Cout, eps=1e-5):
    NH = N * H
    NHh = NH // 2
    WCin = W * Cin
    WCout = W * Cout
    inv_count = 1.0 / float(N * H * W)

    def kernel(x_ref, wcat1_ref, g1_ref, be1_ref,
               wcat2_ref, g2_ref, be2_ref,
               sel_ref, selt_ref,
               max_ref, code_ref, h_scr):
        # --- hoisted once (JAX does not CSE broadcast_in_dim); reused by both convs ---
        y_row = jax.lax.broadcasted_iota(jnp.int32, (NH, 1), 0) % H   # image-local y
        valid_up = y_row >= 1          # row y-1 exists inside the image
        valid_dn = y_row <= H - 2      # row y+1 exists inside the image
        ones_row = jnp.ones((1, NH), jnp.float32)

        def conv3x3(v, wcat_ref):
            # 3x3 pad=1 conv as ONE MXU matmul: K-concat the three dy-shifted
            # copies; dx and x zero-padding are encoded in the banded weight.
            # No conv bias: training-mode BN's mean subtraction cancels it.
            sh_up = jnp.where(valid_up, pltpu.roll(v, shift=1, axis=0), 0.0)       # v[r-1]
            sh_dn = jnp.where(valid_dn, pltpu.roll(v, shift=NH - 1, axis=0), 0.0)  # v[r+1]
            scat = jnp.concatenate([sh_up, v, sh_dn], axis=1).astype(jnp.bfloat16)
            return jnp.dot(scat, wcat_ref[...], preferred_element_type=jnp.float32)

        def bn_relu(v, g_ref, be_ref):
            # Training-mode BatchNorm2d (biased batch stats over N,H,W), f32.
            # Row sums via ones-row matmuls (MXU, keeps the XLU free for rolls);
            # sum/sumsq and scale/shift each collapse into one tiny matmul.
            s1 = jnp.dot(ones_row, v, preferred_element_type=jnp.float32)       # (1, WCout)
            s2 = jnp.dot(ones_row, v * v, preferred_element_type=jnp.float32)   # (1, WCout)
            s12 = jnp.concatenate([s1, s2], axis=0)                             # (2, WCout)
            sc = jnp.dot(s12, sel_ref[...], preferred_element_type=jnp.float32)  # (2, Cout)
            mean = sc[0:1] * inv_count
            # NOTE: E[x^2]-E[x]^2 is fine at these magnitudes; switch to the
            # centered/two-pass form when adding the tiled (v7x) rewrite.
            var = sc[1:2] * inv_count - mean * mean
            scale = g_ref[...] * jax.lax.rsqrt(var + eps)                        # (1, Cout)
            shift = be_ref[...] - mean * scale
            ssf = jnp.dot(jnp.concatenate([scale, shift], axis=0), selt_ref[...],
                          preferred_element_type=jnp.float32)                    # (2, WCout)
            return jnp.maximum(v * ssf[0:1] + ssf[1:2], 0.0)

        h = bn_relu(conv3x3(x_ref[...], wcat1_ref), g1_ref, be1_ref)
        h_scr[...] = bn_relu(conv3x3(h, wcat2_ref), g2_ref, be2_ref)

        # MaxPool2d(2, return_indices=True), row-decimated in-kernel:
        # only even-y rows carry pool windows -> strided sublane reads of the
        # staged BN2 output give the top (y) / bottom (y+1) rows compacted.
        top = h_scr[pl.ds(0, NHh, stride=2), :]       # rows with even y
        bot = h_scr[pl.ds(1, NHh, stride=2), :]       # rows with odd y (= even y + 1)

        best = top                                    # candidate 0: (y, x)
        code = jnp.zeros((NHh, WCout), jnp.int32)
        # Fold each candidate before forming the next (small live set); strict
        # '>' keeps the first max in row-major window order (PyTorch tie-break).
        cand = pltpu.roll(top, shift=WCout - 1, axis=1)            # (y, x+1)
        take = cand > best
        best = jnp.where(take, cand, best)
        code = jnp.where(take, 1, code)
        take = bot > best                                          # (y+1, x)
        best = jnp.where(take, bot, best)
        code = jnp.where(take, 2, code)
        cand = pltpu.roll(bot, shift=WCout - 1, axis=1)            # (y+1, x+1)
        take = cand > best
        best = jnp.where(take, cand, best)
        code = jnp.where(take, 3, code)

        max_ref[...] = best
        code_ref[...] = code.astype(jnp.int8)         # 2-bit window code, 1 B/elem

    return kernel


def _banded_weight_cat(w_pt, W):
    """PyTorch Conv2d weight (Cout, Cin, 3, 3) -> stacked banded matrix
    (3*Cin*W, Cout*W) so that, in the channel-major (rows, C*W) layout,
    concat([shift_up(act), act, shift_dn(act)], -1) @ Wcat == conv(pad=1)."""
    Cout, Cin = int(w_pt.shape[0]), int(w_pt.shape[1])
    w = jnp.asarray(w_pt, jnp.float32)                         # (Cout, Cin, 3, 3)
    xi = jnp.arange(W)[:, None]                                # input column
    xo = jnp.arange(W)[None, :]                                # output column
    b = xi - xo + 1                                            # kernel column, valid [0, 2]
    valid = ((b >= 0) & (b <= 2)).astype(jnp.float32)          # (W, W)
    wb = w[:, :, :, jnp.clip(b, 0, 2)]                         # (Cout, Cin, 3, W, W)
    wb = wb * valid[None, None, None, :, :]
    wb = jnp.transpose(wb, (2, 1, 3, 0, 4))                    # (3, Cin, W_in, Cout, W_out)
    return wb.reshape(3 * Cin * W, Cout * W)


def _vmem_limit_bytes():
    cap = 128 * 1024 * 1024
    try:
        cap = int(getattr(pltpu.get_tpu_info(), "vmem_capacity_bytes", cap))
    except Exception:
        pass
    # ~96 MiB on 128 MiB parts (v5e/v6e), ~48 MiB headroom-capped on v7x (64 MiB).
    return int(min(cap * 3 // 4, 100 * 1024 * 1024))


def conv_layer1(x, params):
    """x: (N, Cin, H, W) NCHW.  Returns (pooled, indices) NCHW, matching
    ConvLayer1.forward (BatchNorm in training mode, PyTorch flat pool indices)."""
    N, Cin, H, W = x.shape
    Cout = params["w1"].shape[0]
    assert H % 2 == 0 and W % 2 == 0
    NH, NHh = N * H, (N * H) // 2
    WCin, WCout = W * Cin, W * Cout
    Hh, Wh = H // 2, W // 2

    # NCHW -> channel-major lane-dense (N*H, Cin*W): only a dim-1/2 swap
    # (minor W axis stays contiguous) -> far cheaper layout glue than NHWC.
    x2d = jnp.transpose(x.astype(jnp.float32), (0, 2, 1, 3)).reshape(NH, WCin)

    # Stacked banded conv weights, bf16 at the MXU boundary.  Conv biases are
    # intentionally NOT passed: BN's batch-mean subtraction cancels them.
    wcat1 = _banded_weight_cat(params["w1"], W).astype(jnp.bfloat16)   # (3*W*Cin,  W*Cout)
    wcat2 = _banded_weight_cat(params["w2"], W).astype(jnp.bfloat16)   # (3*W*Cout, W*Cout)
    g1 = params["g1"].astype(jnp.float32).reshape(1, Cout)
    be1 = params["be1"].astype(jnp.float32).reshape(1, Cout)
    g2 = params["g2"].astype(jnp.float32).reshape(1, Cout)
    be2 = params["be2"].astype(jnp.float32).reshape(1, Cout)
    # Channel selector for the channel-major layout: sel[c*W + x, c] = 1.
    sel = jnp.repeat(jnp.eye(Cout, dtype=jnp.float32), W, axis=0)      # (W*Cout, Cout)
    selt = sel.T                                                       # (Cout, W*Cout)

    kernel = _make_kernel(N, H, W, Cin, Cout)
    vmem = pl.BlockSpec(memory_space=pltpu.MemorySpace.VMEM)
    maxmap, codemap = pl.pallas_call(
        kernel,
        out_shape=(jax.ShapeDtypeStruct((NHh, WCout), jnp.float32),
                   jax.ShapeDtypeStruct((NHh, WCout), jnp.int8)),
        in_specs=[vmem] * 9,
        out_specs=(vmem, vmem),
        scratch_shapes=[pltpu.VMEM((NH, WCout), jnp.float32)],
        compiler_params=pltpu.CompilerParams(vmem_limit_bytes=_vmem_limit_bytes()),
    )(x2d, wcat1, g1, be1, wcat2, g2, be2, sel, selt)

    # Rows are already decimated in-kernel; decimate x (odd columns are window
    # interiors), reconstruct PyTorch flat indices from the 2-bit codes, and
    # swap back to NCHW (again only a dim-1/2 transpose).
    maxmap = maxmap.reshape(N, Hh, Cout, W)[:, :, :, ::2]
    code = codemap.reshape(N, Hh, Cout, W)[:, :, :, ::2].astype(jnp.int32)
    pooled = jnp.transpose(maxmap, (0, 2, 1, 3))                       # (N, Cout, Hh, Wh)
    code = jnp.transpose(code, (0, 2, 1, 3))
    yo = jnp.arange(Hh, dtype=jnp.int32)[None, None, :, None]
    xo = jnp.arange(Wh, dtype=jnp.int32)[None, None, None, :]
    indices = (2 * yo + code // 2) * W + (2 * xo + code % 2)
    return pooled, indices


def _reference(x, params, eps=1e-5):
    """Pure-JAX reference (lax conv, f32) for cross-checking the kernel."""
    def conv(v, w, b):
        out = jax.lax.conv_general_dilated(
            v, w, (1, 1), ((1, 1), (1, 1)),
            dimension_numbers=("NCHW", "OIHW", "NCHW"))
        return out + b[None, :, None, None]

    def bn_relu(v, g, be):
        mean = v.mean(axis=(0, 2, 3), keepdims=True)
        var = ((v - mean) ** 2).mean(axis=(0, 2, 3), keepdims=True)
        y = (v - mean) / jnp.sqrt(var + eps) * g[None, :, None, None] + be[None, :, None, None]
        return jnp.maximum(y, 0.0)

    h = bn_relu(conv(x, params["w1"], params["b1"]), params["g1"], params["be1"])
    h = bn_relu(conv(h, params["w2"], params["b2"]), params["g2"], params["be2"])

    N, C, H, W = h.shape
    win = h.reshape(N, C, H // 2, 2, W // 2, 2).transpose(0, 1, 2, 4, 3, 5)
    win = win.reshape(N, C, H // 2, W // 2, 4)
    pooled = win.max(-1)
    arg = win.argmax(-1).astype(jnp.int32)          # first max (PyTorch tie-break)
    r, s = arg // 2, arg % 2
    yo = jnp.arange(H // 2, dtype=jnp.int32)[None, None, :, None]
    xo = jnp.arange(W // 2, dtype=jnp.int32)[None, None, None, :]
    idx = (2 * yo + r) * W + (2 * xo + s)
    return pooled, idx, h


def init_params(key, cin, cout):
    ks = jax.random.split(key, 8)
    w = lambda k, co, ci: 0.1 * jax.random.normal(k, (co, ci, 3, 3), jnp.float32)
    v = lambda k, c: 0.1 * jax.random.normal(k, (c,), jnp.float32)
    g = lambda k, c: 1.0 + 0.1 * jax.random.normal(k, (c,), jnp.float32)
    return dict(
        w1=w(ks[0], cout, cin), b1=v(ks[1], cout), g1=g(ks[2], cout), be1=v(ks[3], cout),
        w2=w(ks[4], cout, cout), b2=v(ks[5], cout), g2=g(ks[6], cout), be2=v(ks[7], cout),
    )


if __name__ == "__main__":
    key = jax.random.PRNGKey(0)
    kx, kp = jax.random.split(key)

    N, Cin, Cout, H, W = 2, 4, 8, 16, 16
    x = jax.random.normal(kx, (N, Cin, H, W), jnp.float32)
    params = init_params(kp, Cin, Cout)

    pooled, indices = jax.block_until_ready(conv_layer1(x, params))
    ref_p, ref_i, ref_h = _reference(x, params)

    Hh, Wh = H // 2, W // 2
    assert pooled.shape == (N, Cout, Hh, Wh)
    assert indices.shape == (N, Cout, Hh, Wh)
    assert bool(jnp.all(jnp.isfinite(pooled)))

    # Pooled values: bf16 MXU operands vs f32 reference -> loose tolerance.
    err = float(jnp.max(jnp.abs(pooled - ref_p)))
    assert err < 5e-2, err

    # Indices: must lie inside their own 2x2 window and point at a
    # (near-)argmax of the f32 reference map; exact equality may legitimately
    # differ from the reference on near-ties under bf16 rounding.
    yo = jnp.arange(Hh, dtype=jnp.int32)[None, None, :, None]
    xo = jnp.arange(Wh, dtype=jnp.int32)[None, None, None, :]
    iy, ix = indices // W, indices % W
    assert bool(jnp.all((iy // 2 == yo) & (ix // 2 == xo)))
    picked = jnp.take_along_axis(ref_h.reshape(N, Cout, H * W),
                                 indices.reshape(N, Cout, Hh * Wh),
                                 axis=2).reshape(ref_p.shape)
    assert float(jnp.max(ref_p - picked)) < 5e-2
    # Sanity: the overwhelming majority of indices match the f32 argmax exactly.
    assert float(jnp.mean((indices == ref_i).astype(jnp.float32))) > 0.9

    print("KERNEL_OK")
</pallas_src>

<mosaic_0001>
module attributes {stable_mosaic.version = 11 : i64} {
  func.func @kernel(%arg0: memref<32x64xf32, #tpu.memory_space<vmem>>, %arg1: memref<192x128xbf16, #tpu.memory_space<vmem>>, %arg2: memref<1x8xf32, #tpu.memory_space<vmem>>, %arg3: memref<1x8xf32, #tpu.memory_space<vmem>>, %arg4: memref<384x128xbf16, #tpu.memory_space<vmem>>, %arg5: memref<1x8xf32, #tpu.memory_space<vmem>>, %arg6: memref<1x8xf32, #tpu.memory_space<vmem>>, %arg7: memref<128x8xf32, #tpu.memory_space<vmem>>, %arg8: memref<8x128xf32, #tpu.memory_space<vmem>>, %arg9: memref<16x128xf32, #tpu.memory_space<vmem>>, %arg10: memref<16x128xi8, #tpu.memory_space<vmem>>, %arg11: memref<32x128xf32, #tpu.memory_space<vmem>>) attributes {dimension_semantics = [], scalar_prefetch = 0 : i64, scratch_operands = 1 : i64, tpu.core_type = #tpu.core_type<tc>} {
    %0 = tpu.iota {dimensions = array<i32: 0>} : vector<32x1xi32>
    %c16_i32 = arith.constant 16 : i32
    %c0_i32 = arith.constant 0 : i32
    %1 = arith.cmpi eq, %c16_i32, %c0_i32 : i32
    %c1_i32 = arith.constant 1 : i32
    %2 = arith.select %1, %c1_i32, %c16_i32 : i32
    %3 = vector.broadcast %2 : i32 to vector<32x1xi32>
    %4 = arith.remsi %0, %3 : vector<32x1xi32>
    %c0_i32_0 = arith.constant 0 : i32
    %5 = vector.broadcast %c0_i32_0 : i32 to vector<32x1xi32>
    %6 = arith.cmpi ne, %4, %5 : vector<32x1xi32>
    %c0_i32_1 = arith.constant 0 : i32
    %7 = vector.broadcast %c0_i32_1 : i32 to vector<32x1xi32>
    %8 = arith.cmpi slt, %4, %7 : vector<32x1xi32>
    %c0_i32_2 = arith.constant 0 : i32
    %9 = arith.cmpi slt, %2, %c0_i32_2 : i32
    %10 = vector.broadcast %9 : i1 to vector<32x1xi1>
    %11 = vector.broadcast %10 : vector<32x1xi1> to vector<32x1xi1>
    %12 = arith.xori %8, %11 : vector<32x1xi1>
    %13 = arith.andi %12, %6 : vector<32x1xi1>
    %14 = vector.broadcast %2 : i32 to vector<32x1xi32>
    %15 = arith.addi %4, %14 : vector<32x1xi32>
    %16 = arith.select %13, %15, %4 : vector<32x1xi1>, vector<32x1xi32>
    %c1_i32_3 = arith.constant 1 : i32
    %17 = vector.broadcast %c1_i32_3 : i32 to vector<32x1xi32>
    %18 = arith.cmpi sge, %16, %17 : vector<32x1xi32>
    %c14_i32 = arith.constant 14 : i32
    %19 = vector.broadcast %c14_i32 : i32 to vector<32x1xi32>
    %20 = arith.cmpi sle, %16, %19 : vector<32x1xi32>
    %cst = arith.constant 1.000000e+00 : f32
    %21 = vector.broadcast %cst : f32 to vector<1x32xf32>
    %c0 = arith.constant 0 : index
    %c0_4 = arith.constant 0 : index
    %22 = vector.load %arg0[%c0, %c0_4] : memref<32x64xf32, #tpu.memory_space<vmem>>, vector<32x64xf32>
    %c1_i32_5 = arith.constant 1 : i32
    %23 = tpu.dynamic_rotate %22 by %c1_i32_5 dim 0 : vector<32x64xf32>, i32 -> vector<32x64xf32>
    %cst_6 = arith.constant 0.000000e+00 : f32
    %24 = vector.shape_cast %18 : vector<32x1xi1> to vector<32x1xi1>
    %25 = vector.broadcast %24 : vector<32x1xi1> to vector<32x64xi1>
    %26 = vector.broadcast %cst_6 : f32 to vector<32x64xf32>
    %27 = arith.select %25, %23, %26 : vector<32x64xi1>, vector<32x64xf32>
    %c31_i32 = arith.constant 31 : i32
    %28 = tpu.dynamic_rotate %22 by %c31_i32 dim 0 : vector<32x64xf32>, i32 -> vector<32x64xf32>
    %cst_7 = arith.constant 0.000000e+00 : f32
    %29 = vector.shape_cast %20 : vector<32x1xi1> to vector<32x1xi1>
    %30 = vector.broadcast %29 : vector<32x1xi1> to vector<32x64xi1>
    %31 = vector.broadcast %cst_7 : f32 to vector<32x64xf32>
    %32 = arith.select %30, %28, %31 : vector<32x64xi1>, vector<32x64xf32>
    %33 = tpu.concatenate %27, %22, %32 in 1 : vector<32x64xf32>, vector<32x64xf32>, vector<32x64xf32> -> vector<32x192xf32>
    %34 = arith.truncf %33 : vector<32x192xf32> to vector<32x192xbf16>
    %c0_8 = arith.constant 0 : index
    %c0_9 = arith.constant 0 : index
    %35 = vector.load %arg1[%c0_8, %c0_9] : memref<192x128xbf16, #tpu.memory_space<vmem>>, vector<192x128xbf16>
    %cst_10 = arith.constant dense<0.000000e+00> : vector<32x128xf32>
    %36 = tpu.matmul %34, %35, %cst_10 {dimension_numbers = #tpu.dot_dimension_numbers<[1], [0], [0], [1], [0, 0, 1, 1], [], []>} : vector<32x192xbf16>, vector<192x128xbf16>, vector<32x128xf32> -> vector<32x128xf32>
    %cst_11 = arith.constant dense<0.000000e+00> : vector<1x128xf32>
    %37 = tpu.matmul %21, %36, %cst_11 {dimension_numbers = #tpu.dot_dimension_numbers<[1], [0], [0], [1], [0, 0, 1, 1], [], []>} : vector<1x32xf32>, vector<32x128xf32>, vector<1x128xf32> -> vector<1x128xf32>
    %38 = arith.mulf %36, %36 : vector<32x128xf32>
    %cst_12 = arith.constant dense<0.000000e+00> : vector<1x128xf32>
    %39 = tpu.matmul %21, %38, %cst_12 {dimension_numbers = #tpu.dot_dimension_numbers<[1], [0], [0], [1], [0, 0, 1, 1], [], []>} : vector<1x32xf32>, vector<32x128xf32>, vector<1x128xf32> -> vector<1x128xf32>
    %40 = tpu.concatenate %37, %39 in 0 : vector<1x128xf32>, vector<1x128xf32> -> vector<2x128xf32>
    %c0_13 = arith.constant 0 : index
    %c0_14 = arith.constant 0 : index
    %41 = vector.load %arg7[%c0_13, %c0_14] : memref<128x8xf32, #tpu.memory_space<vmem>>, vector<128x8xf32>
    %cst_15 = arith.constant dense<0.000000e+00> : vector<2x8xf32>
    %42 = tpu.matmul %40, %41, %cst_15 {dimension_numbers = #tpu.dot_dimension_numbers<[1], [0], [0], [1], [0, 0, 1, 1], [], []>} : vector<2x128xf32>, vector<128x8xf32>, vector<2x8xf32> -> vector<2x8xf32>
    %43 = vector.extract_strided_slice %42 {offsets = [0, 0], sizes = [1, 8], strides = [1, 1]} : vector<2x8xf32> to vector<1x8xf32>
    %cst_16 = arith.constant 0.001953125 : f32
    %44 = vector.broadcast %cst_16 : f32 to vector<1x8xf32>
    %45 = arith.mulf %43, %44 : vector<1x8xf32>
    %46 = vector.extract_strided_slice %42 {offsets = [1, 0], sizes = [1, 8], strides = [1, 1]} : vector<2x8xf32> to vector<1x8xf32>
    %cst_17 = arith.constant 0.001953125 : f32
    %47 = vector.broadcast %cst_17 : f32 to vector<1x8xf32>
    %48 = arith.mulf %46, %47 : vector<1x8xf32>
    %49 = arith.mulf %45, %45 : vector<1x8xf32>
    %50 = arith.subf %48, %49 : vector<1x8xf32>
    %c0_18 = arith.constant 0 : index
    %c0_19 = arith.constant 0 : index
    %51 = vector.load %arg2[%c0_18, %c0_19] : memref<1x8xf32, #tpu.memory_space<vmem>>, vector<1x8xf32>
    %cst_20 = arith.constant 9.99999974E-6 : f32
    %52 = vector.broadcast %cst_20 : f32 to vector<1x8xf32>
    %53 = arith.addf %50, %52 : vector<1x8xf32>
    %54 = math.rsqrt %53 : vector<1x8xf32>
    %55 = arith.mulf %51, %54 : vector<1x8xf32>
    %c0_21 = arith.constant 0 : index
    %c0_22 = arith.constant 0 : index
    %56 = vector.load %arg3[%c0_21, %c0_22] : memref<1x8xf32, #tpu.memory_space<vmem>>, vector<1x8xf32>
    %57 = arith.mulf %45, %55 : vector<1x8xf32>
    %58 = arith.subf %56, %57 : vector<1x8xf32>
    %59 = tpu.concatenate %55, %58 in 0 : vector<1x8xf32>, vector<1x8xf32> -> vector<2x8xf32>
    %c0_23 = arith.constant 0 : index
    %c0_24 = arith.constant 0 : index
    %60 = vector.load %arg8[%c0_23, %c0_24] : memref<8x128xf32, #tpu.memory_space<vmem>>, vector<8x128xf32>
    %cst_25 = arith.constant dense<0.000000e+00> : vector<2x128xf32>
    %61 = tpu.matmul %59, %60, %cst_25 {dimension_numbers = #tpu.dot_dimension_numbers<[1], [0], [0], [1], [0, 0, 1, 1], [], []>} : vector<2x8xf32>, vector<8x128xf32>, vector<2x128xf32> -> vector<2x128xf32>
    %62 = vector.extract_strided_slice %61 {offsets = [0, 0], sizes = [1, 128], strides = [1, 1]} : vector<2x128xf32> to vector<1x128xf32>
    %63 = vector.broadcast %62 : vector<1x128xf32> to vector<32x128xf32>
    %64 = arith.mulf %36, %63 : vector<32x128xf32>
    %65 = vector.extract_strided_slice %61 {offsets = [1, 0], sizes = [1, 128], strides = [1, 1]} : vector<2x128xf32> to vector<1x128xf32>
    %66 = vector.broadcast %65 : vector<1x128xf32> to vector<32x128xf32>
    %67 = arith.addf %64, %66 : vector<32x128xf32>
    %cst_26 = arith.constant 0.000000e+00 : f32
    %68 = vector.broadcast %cst_26 : f32 to vector<32x128xf32>
    %69 = arith.maximumf %67, %68 : vector<32x128xf32>
    %c1_i32_27 = arith.constant 1 : i32
    %70 = tpu.dynamic_rotate %69 by %c1_i32_27 dim 0 : vector<32x128xf32>, i32 -> vector<32x128xf32>
    %cst_28 = arith.constant 0.000000e+00 : f32
    %71 = vector.shape_cast %18 : vector<32x1xi1> to vector<32x1xi1>
    %72 = vector.broadcast %71 : vector<32x1xi1> to vector<32x128xi1>
    %73 = vector.broadcast %cst_28 : f32 to vector<32x128xf32>
    %74 = arith.select %72, %70, %73 : vector<32x128xi1>, vector<32x128xf32>
    %c31_i32_29 = arith.constant 31 : i32
    %75 = tpu.dynamic_rotate %69 by %c31_i32_29 dim 0 : vector<32x128xf32>, i32 -> vector<32x128xf32>
    %cst_30 = arith.constant 0.000000e+00 : f32
    %76 = vector.shape_cast %20 : vector<32x1xi1> to vector<32x1xi1>
    %77 = vector.broadcast %76 : vector<32x1xi1> to vector<32x128xi1>
    %78 = vector.broadcast %cst_30 : f32 to vector<32x128xf32>
    %79 = arith.select %77, %75, %78 : vector<32x128xi1>, vector<32x128xf32>
    %80 = tpu.concatenate %74, %69, %79 in 1 : vector<32x128xf32>, vector<32x128xf32>, vector<32x128xf32> -> vector<32x384xf32>
    %81 = arith.truncf %80 : vector<32x384xf32> to vector<32x384xbf16>
    %c0_31 = arith.constant 0 : index
    %c0_32 = arith.constant 0 : index
    %82 = vector.load %arg4[%c0_31, %c0_32] : memref<384x128xbf16, #tpu.memory_space<vmem>>, vector<384x128xbf16>
    %cst_33 = arith.constant dense<0.000000e+00> : vector<32x128xf32>
    %83 = tpu.matmul %81, %82, %cst_33 {dimension_numbers = #tpu.dot_dimension_numbers<[1], [0], [0], [1], [0, 0, 1, 1], [], []>} : vector<32x384xbf16>, vector<384x128xbf16>, vector<32x128xf32> -> vector<32x128xf32>
    %cst_34 = arith.constant dense<0.000000e+00> : vector<1x128xf32>
    %84 = tpu.matmul %21, %83, %cst_34 {dimension_numbers = #tpu.dot_dimension_numbers<[1], [0], [0], [1], [0, 0, 1, 1], [], []>} : vector<1x32xf32>, vector<32x128xf32>, vector<1x128xf32> -> vector<1x128xf32>
    %85 = arith.mulf %83, %83 : vector<32x128xf32>
    %cst_35 = arith.constant dense<0.000000e+00> : vector<1x128xf32>
    %86 = tpu.matmul %21, %85, %cst_35 {dimension_numbers = #tpu.dot_dimension_numbers<[1], [0], [0], [1], [0, 0, 1, 1], [], []>} : vector<1x32xf32>, vector<32x128xf32>, vector<1x128xf32> -> vector<1x128xf32>
    %87 = tpu.concatenate %84, %86 in 0 : vector<1x128xf32>, vector<1x128xf32> -> vector<2x128xf32>
    %c0_36 = arith.constant 0 : index
    %c0_37 = arith.constant 0 : index
    %88 = vector.load %arg7[%c0_36, %c0_37] : memref<128x8xf32, #tpu.memory_space<vmem>>, vector<128x8xf32>
    %cst_38 = arith.constant dense<0.000000e+00> : vector<2x8xf32>
    %89 = tpu.matmul %87, %88, %cst_38 {dimension_numbers = #tpu.dot_dimension_numbers<[1], [0], [0], [1], [0, 0, 1, 1], [], []>} : vector<2x128xf32>, vector<128x8xf32>, vector<2x8xf32> -> vector<2x8xf32>
    %90 = vector.extract_strided_slice %89 {offsets = [0, 0], sizes = [1, 8], strides = [1, 1]} : vector<2x8xf32> to vector<1x8xf32>
    %cst_39 = arith.constant 0.001953125 : f32
    %91 = vector.broadcast %cst_39 : f32 to vector<1x8xf32>
    %92 = arith.mulf %90, %91 : vector<1x8xf32>
    %93 = vector.extract_strided_slice %89 {offsets = [1, 0], sizes = [1, 8], strides = [1, 1]} : vector<2x8xf32> to vector<1x8xf32>
    %cst_40 = arith.constant 0.001953125 : f32
    %94 = vector.broadcast %cst_40 : f32 to vector<1x8xf32>
    %95 = arith.mulf %93, %94 : vector<1x8xf32>
    %96 = arith.mulf %92, %92 : vector<1x8xf32>
    %97 = arith.subf %95, %96 : vector<1x8xf32>
    %c0_41 = arith.constant 0 : index
    %c0_42 = arith.constant 0 : index
    %98 = vector.load %arg5[%c0_41, %c0_42] : memref<1x8xf32, #tpu.memory_space<vmem>>, vector<1x8xf32>
    %cst_43 = arith.constant 9.99999974E-6 : f32
    %99 = vector.broadcast %cst_43 : f32 to vector<1x8xf32>
    %100 = arith.addf %97, %99 : vector<1x8xf32>
    %101 = math.rsqrt %100 : vector<1x8xf32>
    %102 = arith.mulf %98, %101 : vector<1x8xf32>
    %c0_44 = arith.constant 0 : index
    %c0_45 = arith.constant 0 : index
    %103 = vector.load %arg6[%c0_44, %c0_45] : memref<1x8xf32, #tpu.memory_space<vmem>>, vector<1x8xf32>
    %104 = arith.mulf %92, %102 : vector<1x8xf32>
    %105 = arith.subf %103, %104 : vector<1x8xf32>
    %106 = tpu.concatenate %102, %105 in 0 : vector<1x8xf32>, vector<1x8xf32> -> vector<2x8xf32>
    %c0_46 = arith.constant 0 : index
    %c0_47 = arith.constant 0 : index
    %107 = vector.load %arg8[%c0_46, %c0_47] : memref<8x128xf32, #tpu.memory_space<vmem>>, vector<8x128xf32>
    %cst_48 = arith.constant dense<0.000000e+00> : vector<2x128xf32>
    %108 = tpu.matmul %106, %107, %cst_48 {dimension_numbers = #tpu.dot_dimension_numbers<[1], [0], [0], [1], [0, 0, 1, 1], [], []>} : vector<2x8xf32>, vector<8x128xf32>, vector<2x128xf32> -> vector<2x128xf32>
    %109 = vector.extract_strided_slice %108 {offsets = [0, 0], sizes = [1, 128], strides = [1, 1]} : vector<2x128xf32> to vector<1x128xf32>
    %110 = vector.broadcast %109 : vector<1x128xf32> to vector<32x128xf32>
    %111 = arith.mulf %83, %110 : vector<32x128xf32>
    %112 = vector.extract_strided_slice %108 {offsets = [1, 0], sizes = [1, 128], strides = [1, 1]} : vector<2x128xf32> to vector<1x128xf32>
    %113 = vector.broadcast %112 : vector<1x128xf32> to vector<32x128xf32>
    %114 = arith.addf %111, %113 : vector<32x128xf32>
    %cst_49 = arith.constant 0.000000e+00 : f32
    %115 = vector.broadcast %cst_49 : f32 to vector<32x128xf32>
    %116 = arith.maximumf %114, %115 : vector<32x128xf32>
    %c0_50 = arith.constant 0 : index
    %c0_51 = arith.constant 0 : index
    %117 = vector.load %arg11[%c0_50, %c0_51] : memref<32x128xf32, #tpu.memory_space<vmem>>, vector<32x128xf32>
    tpu.vector_store %arg11[%c0_50, %c0_51], %116 {strides = array<i32>} : memref<32x128xf32, #tpu.memory_space<vmem>>, vector<32x128xf32>,
    %c0_52 = arith.constant 0 : index
    %c0_53 = arith.constant 0 : index
    %118 = tpu.strided_load %arg11[%c0_52, %c0_53] {strides = array<i32: 2, 1>} : memref<32x128xf32, #tpu.memory_space<vmem>>, vector<16x128xf32>
    %c1 = arith.constant 1 : index
    %c0_54 = arith.constant 0 : index
    %119 = tpu.strided_load %arg11[%c1, %c0_54] {strides = array<i32: 2, 1>} : memref<32x128xf32, #tpu.memory_space<vmem>>, vector<16x128xf32>
    %c0_i32_55 = arith.constant 0 : i32
    %120 = vector.broadcast %c0_i32_55 : i32 to vector<16x128xi32>
    %c127_i32 = arith.constant 127 : i32
    %121 = tpu.dynamic_rotate %118 by %c127_i32 dim 1 : vector<16x128xf32>, i32 -> vector<16x128xf32>
    %122 = arith.cmpf ogt, %121, %118 : vector<16x128xf32>
    %123 = arith.select %122, %121, %118 : vector<16x128xi1>, vector<16x128xf32>
    %c1_i32_56 = arith.constant 1 : i32
    %124 = vector.broadcast %c1_i32_56 : i32 to vector<16x128xi32>
    %125 = arith.select %122, %124, %120 : vector<16x128xi1>, vector<16x128xi32>
    %126 = arith.cmpf ogt, %119, %123 : vector<16x128xf32>
    %127 = arith.select %126, %119, %123 : vector<16x128xi1>, vector<16x128xf32>
    %c2_i32 = arith.constant 2 : i32
    %128 = vector.broadcast %c2_i32 : i32 to vector<16x128xi32>
    %129 = arith.select %126, %128, %125 : vector<16x128xi1>, vector<16x128xi32>
    %c127_i32_57 = arith.constant 127 : i32
    %130 = tpu.dynamic_rotate %119 by %c127_i32_57 dim 1 : vector<16x128xf32>, i32 -> vector<16x128xf32>
    %131 = arith.cmpf ogt, %130, %127 : vector<16x128xf32>
    %132 = arith.select %131, %130, %127 : vector<16x128xi1>, vector<16x128xf32>
    %c3_i32 = arith.constant 3 : i32
    %133 = vector.broadcast %c3_i32 : i32 to vector<16x128xi32>
    %134 = arith.select %131, %133, %129 : vector<16x128xi1>, vector<16x128xi32>
    %c0_58 = arith.constant 0 : index
    %c0_59 = arith.constant 0 : index
    %135 = vector.load %arg9[%c0_58, %c0_59] : memref<16x128xf32, #tpu.memory_space<vmem>>, vector<16x128xf32>
    tpu.vector_store %arg9[%c0_58, %c0_59], %132 {strides = array<i32>} : memref<16x128xf32, #tpu.memory_space<vmem>>, vector<16x128xf32>,
    %136 = arith.trunci %134 : vector<16x128xi32> to vector<16x128xi8>
    %c0_60 = arith.constant 0 : index
    %c0_61 = arith.constant 0 : index
    %137 = vector.load %arg10[%c0_60, %c0_61] : memref<16x128xi8, #tpu.memory_space<vmem>>, vector<16x128xi8>
    tpu.vector_store %arg10[%c0_60, %c0_61], %136 {strides = array<i32>} : memref<16x128xi8, #tpu.memory_space<vmem>>, vector<16x128xi8>,
    return
  }
}

</mosaic_0001>

<bundles_post_ra>
// kernel: tpu_custom_call.1
= control target key start
LH: loop header
LB: loop body
LE: loop exit
PB: predicated region body
PF: predicated region fallthrough
CT: control target
= control target key end

     0   :  { %16 = vsyncpa [#allocation4], 0  ;;  %s2385_s0 = inlined_call_operand.vmem [shape: f32[32,64], index: 0, kind: input, shape index: {}]   ;;  %s2386_s1 = inlined_call_operand.vmem [shape: bf16[192,128], index: 1, kind: input, shape index: {}]   ;;  %s2387_s2 = inlined_call_operand.vmem [shape: f32[1,8], index: 2, kind: input, shape index: {}]   ;;  %s2388_s3 = inlined_call_operand.vmem [shape: f32[1,8], index: 3, kind: input, shape index: {}]   ;;  %s2389_s4 = inlined_call_operand.hbm [shape: bf16[384,128], index: 4, kind: input, shape index: {}]   ;;  %s2390_s5 = inlined_call_operand.vmem [shape: f32[1,8], index: 5, kind: input, shape index: {}]   ;;  %s2391_s6 = inlined_call_operand.vmem [shape: f32[1,8], index: 6, kind: input, shape index: {}]   ;;  %s2392_s7 = inlined_call_operand.vmem [shape: f32[128,8], index: 7, kind: input, shape index: {}]   ;;  %s2393_s8 = inlined_call_operand.vmem [shape: f32[8,128], index: 8, kind: input, shape index: {}]   ;;  %s2394_s9 = inlined_call_operand.hbm [shape: f32[16,128], index: 9, kind: output, shape index: {0}]   ;;  %s2395_s10 = inlined_call_operand.hbm [shape: s8[16,128], index: 10, kind: output, shape index: {1}]  }
   0x1   :  { %17 = vsyncpa [#allocation5], 0 }
   0x2   :  { %18 = vsyncpa [#allocation8], 0  ;;  %s1879_s13 = smov [#allocation3]  }
   0x3   :  { %s32_s14 = sshll.u32 %s1879_s13, 4  ;;  %s33_s14 = int_to_ptr.vmem [resolvable:$true] %s32_s14 }
   0x4   :  { %s1821_s15 = scalar_lea.vmem %s33_s14, 3072  ;;  %p1826_p1 = scmp.lt.s32.totalorder %s33_s14, %s33_s14 }
   0x5   :  { %p1822_p0 = scmp.ne.s32.totalorder %s33_s14, %s1821_s15  ;;  %p1827_p2 = scmp.lt.s32.totalorder %s1821_s15, %s1821_s15 }
   0x7   :  { %p1828_p3 = por %p1827_p2, %p1826_p1 }
   0x9   :  { %p1829_p4 = pnand %p1828_p3, %p1822_p0 }
   0xb   :  { %1832 = shalt.err (!%p1829_p4)
}
   0xc   :  { %s1880_s16 = smov 64   ;;  %s1881_s17 = smov 4  }
   0xd   :  { %38 = dma.hbm_to_vmem [thread:$0]  %s2389_s4, 3072, %s33_s14, [#allocation4], %s1880_s16, %s1880_s16, %s1881_s17  }
   0xe   :  { %1873 = dma.done.wait [#allocation4], 3072  }
   0xf   :  { %1874 = vsyncadd [#allocation4], 4294964224  ;;  %v51_v0 = vlaneseq  ;;  %v1882_v1 = vmov 0   ;;  %v112_v5 = vld [vmem:[%s2385_s0] sm:$0xff]  ;;  %v113_v6 = vld [vmem:[%s2385_s0 + $0x8] sm:$0xff]  ;;  %vm174_vm3 = vcmask 523264  }
  0x10   :  { %285 = vmatprep.subr.bf16.mxu0 %v1882_v1  ;;  %v114_v7 = vld [vmem:[%s2385_s0 + $0x10] sm:$0xff]  ;;  %v117_v10 = vrot.slane %v113_v6, 7  ;;  %v138_v11 = vrot.slane %v113_v6, 1  ;;  %v1763_v12 = vpack.i.bf16 %v113_v6, %v112_v5  ;;  %v116_v13 = vrot.slane %v112_v5, 7  ;;  %v115_v14 = vld [vmem:[%s2385_s0 + $0x18] sm:$0xff]  ;;  %v1775_v35 = vld [vmem:[%s2386_s1 + $0x28] sm:$0xff]  }
  0x11   :  { %v1956_v2 = vshrl.u32 %v51_v0, 7  ;;  %v137_v15 = vrot.slane %v112_v5, 1  ;;  %v119_v16 = vrot.slane %v115_v14, 7  ;;  %v140_v17 = vrot.slane %v115_v14, 1  ;;  %v1773_v18 = vld [vmem:[%s2386_s1 + $0x38] sm:$0xff]   ;;  %v1774_v23 = vld [vmem:[%s2386_s1 + $0x30] sm:$0xff]  }
  0x12   :  { %1764 = vrot.lane.b32.xlu0 %v1763_v12, %s1880_s16  ;;  %v1768_v19 = vpack.i.bf16 %v115_v14, %v114_v7  ;;  %v118_v20 = vrot.slane %v114_v7, 7  ;;  %v139_v21 = vrot.slane %v114_v7, 1  ;;  %286 = vmatpush1.bf16.msra.mxu0 %v1773_v18  ;;  %v1776_v38 = vld [vmem:[%s2386_s1 + $0x20] sm:$0xff]   ;;  %v1777_v39 = vld [vmem:[%s2386_s1 + $0x18] sm:$0xff]   ;;  %v1778_v40 = vld [vmem:[%s2386_s1 + $0x10] sm:$0xff]   ;;  %vm1884_vm7 = vmmov 0  }
  0x13   :  { %v53_v3 = vadd.s32 8, %v1956_v2  ;;  %v55_v4 = vadd.s32 24, %v1956_v2  ;;  %vm141_vm0 = vcmp.lt.s32.totalorder %v1956_v2, 7  ;;  %vm120_vm1 = vcmp.lt.s32.totalorder %v1956_v2, 1  ;;  %287 = vmatprep.subr.bf16.mxu0 %v1882_v1  ;;  %v1779_v41 = vld [vmem:[%s2386_s1 + $0x8] sm:$0xff]   ;;  %v1780_v42 = vld [vmem:[%s2386_s1] sm:$0xff]  }
  0x14   :  { %v123_v22 = vsel %vm120_vm1, %v116_v13, %v117_v10  ;;  %v144_v25 = vsel %vm141_vm0, %v137_v15, %v138_v11  ;;  %v124_v26 = vsel %vm120_vm1, %v119_v16, %v116_v13  ;;  %v145_v27 = vsel %vm141_vm0, %v140_v17, %v137_v15  ;;  %v1781_v43 = vld [vmem:[%s2386_s1 + $0x58] sm:$0xff]   ;;  %v1782_v44 = vld [vmem:[%s2386_s1 + $0x50] sm:$0xff]   ;;  %v1783_v45 = vld [vmem:[%s2386_s1 + $0x48] sm:$0xff]   ;;  %s1890_s4 = smov [#allocation7]  }
  0x15   :  { %v67_v8 = vand.u32 15, %v53_v3  ;;  %v81_v9 = vand.u32 15, %v55_v4  ;;  %v143_v28 = vsel %vm141_vm0, %v138_v11, %v139_v21  ;;  %v142_v29 = vsel %vm141_vm0, %v139_v21, %v140_v17  ;;  %v1784_v46 = vld [vmem:[%s2386_s1 + $0x40] sm:$0xff]   ;;  %v2108_v18 = vld [vmem:[%s2392_s7 + $0x78] sm:$0xff]  ;;  %s1435_s23 = sshll.u32 %s1890_s4, 4  ;;  %s1436_s23 = int_to_ptr.vmem [resolvable:$true] %s1435_s23 }
  0x16   :  { %v121_v30 = vsel %vm120_vm1, %v118_v20, %v119_v16  ;;  %v122_v32 = vsel %vm120_vm1, %v117_v10, %v118_v20  ;;  %1769 = vrot.lane.b32.xlu0 %v1768_v19, %s1880_s16  ;;  %288 = vmatpush1.bf16.msra.mxu0 %v1774_v23  ;;  %v60_v47 = vand.u32 15, %v1956_v2  ;;  %v54_v48 = vadd.s32 16, %v1956_v2  ;;  %v2116_v19 = vld [vmem:[%s2392_s7 + $0x70] sm:$0xff]  ;;  %v2125_v20 = vld [vmem:[%s2392_s7 + $0x68] sm:$0xff]  ;;  %v2132_v21 = vld [vmem:[%s2392_s7 + $0x60] sm:$0xff] }
  0x17   :  { %vm1983_vm2 = vcmp.le.s32.totalorder %v67_v8, 14  ;;  %vm2005_vm4 = vcmp.le.s32.totalorder %v81_v9, 14  ;;  %289 = vmatprep.subr.bf16.mxu0 %v1882_v1  ;;  %v1883_v4 = vmov 0.0   ;;  %vm334_vm8 = vcmask 261120   ;;  %v2146_v23 = vld [vmem:[%s2392_s7 + $0x50] sm:$0xff] }
  0x18   :  { %v155_v31 = vsel %vm1983_vm2, %v143_v28, 0.0  ;;  %v157_v36 = vsel %vm2005_vm4, %v145_v27, 0.0  ;;  %vm2054_vm5 = vcmp.ge.s32.totalorder %v60_v47, 1  ;;  %v74_v50 = vand.u32 15, %v54_v48  ;;  %1614 = vmatprep.subr.mxu1 %v1883_v4  ;;  %1622 = vmatprep.mubr.msk.f32.mxu1 %vm1884_vm7, %v1883_v4  ;;  %v2167_v27 = vld [vmem:[%s2392_s7 + $0x38] sm:$0xff]  ;;  %v2174_v28 = vld [vmem:[%s2392_s7 + $0x30] sm:$0xff] }
  0x19   :  { %v180_v33 = vpack.c.bf16 %v155_v31, %v144_v25  ;;  %v182_v37 = vpack.c.bf16 %v157_v36, %v142_v29  ;;  %v133_v52 = vsel %vm2054_vm5, %v124_v26, 0.0  ;;  %v1885_v17 = vmov 1.0   ;;  %v2153_v25 = vld [vmem:[%s2392_s7 + $0x48] sm:$0xff]  ;;  %v2160_v26 = vld [vmem:[%s2392_s7 + $0x40] sm:$0xff]  ;;  %v2195_v31 = vld [vmem:[%s2392_s7 + $0x18] sm:$0xff] }
  0x1a   :  { %290 = vmatpush1.bf16.msra.mxu0 %v1775_v35  ;;  %vm2060_vm6 = vcmp.ge.s32.totalorder %v74_v50, 1  ;;  %v2181_v29 = vld [vmem:[%s2392_s7 + $0x28] sm:$0xff]  ;;  %v2218_v35 = vld [vmem:[%s2392_s7] sm:$0xff]  ;;  %vm485_vm9 = vcmask 1040384   ;;  %v1789_v47 = vld [vmem:[#allocation3 + $0x30] sm:$0xff]   ;;  %vm611_vm10 = vcmask 64512  }
  0x1b   :  { %1463 = vmatprep.mubr.msk.bf16.mxu0 %vm174_vm3, %v180_v33  ;;  %291 = vmatprep.subr.bf16.mxu0 %v1882_v1  ;;  %v135_v60 = vsel %vm2060_vm6, %v122_v32, 0.0  ;;  %v2202_v32 = vld [vmem:[%s2392_s7 + $0x10] sm:$0xff]  ;;  %v2211_v33 = vld [vmem:[%s2392_s7 + $0x8] sm:$0xff]  ;;  %vm1887_vm11 = vmmov 1  }
  0x1c   :  { %v1791_v48 = vld [vmem:[#allocation3 + $0x68] sm:$0xff]   ;;  %vm1492_vm12 = vmpackc.low %vm1887_vm11, %vm2054_vm5 }
  0x1d   :  { %v1792_v50 = vld [vmem:[#allocation3 + $0x28] sm:$0xff]   ;;  %vm1498_vm13 = vmpackc.low %vm1983_vm2, %vm1887_vm11 }
  0x1e   :  { %292 = vmatpush1.bf16.msra.mxu0 %v1776_v38  ;;  %vm1501_vm14 = vmpackc.low %vm2005_vm4, %vm1887_vm11 }
  0x1f   :  { %293 = vmatprep.subr.bf16.mxu0 %v1882_v1  ;;  %vm1495_vm15 = vmpackc.low %vm1887_vm11, %vm2060_vm6 }
  0x22   :  { %294 = vmatpush1.bf16.msra.mxu0 %v1777_v39 }
  0x23   :  { %295 = vmatprep.subr.bf16.mxu0 %v1882_v1 }
  0x26   :  { %296 = vmatpush1.bf16.msra.mxu0 %v1778_v40 }
  0x27   :  { %297 = vmatprep.subr.bf16.mxu0 %v1882_v1 }
  0x2a   :  { %298 = vmatpush1.bf16.msra.mxu0 %v1779_v41 }
  0x2b   :  { %299 = vmatprep.subr.bf16.mxu0 %v1882_v1 }
  0x2e   :  { %300 = vmatpush1.bf16.msra.mxu0 %v1780_v42  ;;  %v2228_v42 = vld [vmem:[%s2393_s8] sm:$0xff] }
  0x2f   :  { %309 = vmatprep.subr.bf16.mxu0 %v1882_v1 }
  0x32   :  { %310 = vmatpush2.bf16.msra.mxu0 %v1781_v43  ;;  %v1785_v43 = vld [vmem:[#allocation3 + $0x78] sm:$0xff]  }
  0x33   :  { %311 = vmatprep.subr.bf16.mxu0 %v1882_v1 }
  0x36   :  { %312 = vmatpush2.bf16.msra.mxu0 %v1782_v44  ;;  %v1786_v44 = vld [vmem:[#allocation3 + $0x38] sm:$0xff]  }
  0x37   :  { %313 = vmatprep.subr.bf16.mxu0 %v1882_v1 }
  0x3a   :  { %314 = vmatpush2.bf16.msra.mxu0 %v1783_v45  ;;  %v1787_v45 = vld [vmem:[#allocation3 + $0xb8] sm:$0xff]  }
  0x3b   :  { %315 = vmatprep.subr.bf16.mxu0 %v1882_v1 }
  0x3e   :  { %316 = vmatpush2.bf16.msra.mxu0 %v1784_v46  ;;  %v1788_v46 = vld [vmem:[#allocation3 + $0x70] sm:$0xff]  }
  0x3f   :  { %1603 = vmatprep.subr.mxu0 %v1883_v4 }
  0x84   :  { %v1765_v51 = vpop.permute.xlu0 %1764 }
  0x85   :  { %v1767_v53 = vunpack.i.h.bf16 %v1765_v51  ;;  %v1766_v54 = vunpack.i.l.bf16 %v1765_v51  ;;  %v1794_v51 = vld [vmem:[#allocation3 + $0x60] sm:$0xff]  }
  0x87   :  { %v175_v56 = vsel %vm174_vm3, %v133_v52, %v1766_v54  ;;  %v176_v57 = vsel %vm174_vm3, %v123_v22, %v1767_v53  ;;  %v2139_v22 = vld [vmem:[%s2392_s7 + $0x58] sm:$0xff]  ;;  %v1795_v52 = vld [vmem:[#allocation3 + $0x20] sm:$0xff]  }
  0x88   :  { %v179_v58 = vpack.c.bf16 %v176_v57, %v175_v56  ;;  %v1770_v59 = vpop.permute.xlu0 %1769  ;;  %v1797_v53 = vld [vmem:[#allocation3 + $0x58] sm:$0xff]  }
  0x89   :  { %v1772_v61 = vunpack.i.h.bf16 %v1770_v59  ;;  %v1771_v62 = vunpack.i.l.bf16 %v1770_v59  ;;  %v1798_v54 = vld [vmem:[#allocation3 + $0x18] sm:$0xff]  }
  0x8a   :  { %318 = vmatmul.mubr.bf16.vlgmr.msra.gmra.mxu0 %v179_v58 }
  0x8b   :  { %1464 = vmatprep.mubr.msk.bf16.mxu0 %vm174_vm3, %v182_v37  ;;  %v177_v63 = vsel %vm174_vm3, %v135_v60, %v1771_v62  ;;  %v178_v0 = vsel %vm174_vm3, %v121_v30, %v1772_v61  ;;  %v2188_v30 = vld [vmem:[%s2392_s7 + $0x20] sm:$0xff] }
  0x8c   :  { %v181_v3 = vpack.c.bf16 %v178_v0, %v177_v63  ;;  %v1886_v63 = vmov 1966171168  }
  0x8d   :  { %v584_v0 = vunpack.c.l.s4 %v1886_v63 }
  0x92   :  { %326 = vmatmul.mubr.bf16.gmra.mxu0 %v181_v3  ;;  %v585_v3 = vunpack.c.0.s8 %v584_v0 }
  0x93   :  { %1611 = vmatprep.mubr.msk.f32.mxu0 %vm1884_vm7, %v1883_v4 }
 0x14a   :  { %v2077_v5 = vpop.f32.mrf.mxu0 }
 0x14b   :  { %v408_v16 = vmul.f32 %v2077_v5, %v2077_v5 }
 0x14c   :  { %v321_v6 = vpop.f32.mrf.mxu0 }
 0x14d   :  { %v2232_v6 = vsub.s32 %v585_v3, %v1956_v2 }
 0x14e   :  { %v2079_v7 = vpop.f32.mrf.mxu0 }
 0x14f   :  { %v409_v15 = vmul.f32 %v2079_v7, %v2079_v7 }
 0x150   :  { %v324_v8 = vpop.f32.mrf.mxu0 }
 0x152   :  { %v2081_v9 = vpop.f32.mrf.mxu0 }
 0x153   :  { %v410_v14 = vmul.f32 %v2081_v9, %v2081_v9 }
 0x154   :  { %v329_v10 = vpop.f32.mrf.mxu0 }
 0x156   :  { %v2083_v11 = vpop.f32.mrf.mxu0 }
 0x157   :  { %1604 = vmatpush3.msra.mxu0 %v2083_v11  ;;  %v411_v12 = vmul.f32 %v2083_v11, %v2083_v11 }
 0x158   :  { %v332_v13 = vpop.f32.mrf.mxu0  ;;  %1605 = vmatprep.subr.mxu0 %v1883_v4 }
 0x159   :  { %1606 = vmatpush3.msra.mxu0 %v2081_v9  ;;  %1615 = vmatpush3.msra.mxu1 %v411_v12  ;;  %v579_v13 = vld [vmem:[%s2387_s2] sm:$0x1] }
 0x15a   :  { %1607 = vmatprep.subr.mxu0 %v1883_v4  ;;  %1616 = vmatprep.subr.mxu1 %v1883_v4 }
 0x15b   :  { %1608 = vmatpush3.msra.mxu0 %v2079_v7  ;;  %1617 = vmatpush3.msra.mxu1 %v410_v14 }
 0x15c   :  { %1609 = vmatprep.subr.mxu0 %v1883_v4  ;;  %1618 = vmatprep.subr.mxu1 %v1883_v4 }
 0x15d   :  { %1610 = vmatpush3.msra.mxu0 %v2077_v5  ;;  %1619 = vmatpush3.msra.mxu1 %v409_v15 }
 0x15e   :  { %1620 = vmatprep.subr.mxu1 %v1883_v4  ;;  %1612 = vmatmul.mubr.msk.f32.vlgmr.msra.gmra.mxu0 %vm334_vm8, %v1885_v17 }
 0x15f   :  { %1621 = vmatpush3.msra.mxu1 %v408_v16  ;;  %1536 = vmatprep.subr.bf16.mxu0 %v1785_v43  ;;  %v600_v16 = vld [vmem:[%s2388_s3] sm:$0x1]  ;;  %v1793_v43 = vld [vmem:[#allocation3 + $0xa8] sm:$0xff]  }
 0x160   :  { %1623 = vmatmul.mubr.msk.f32.vlgmr.msra.gmra.mxu1 %vm334_vm8, %v1885_v17  ;;  %1625 = vmatprep.subr.mxu1 %v1883_v4 }
 0x161   :  { %1626 = vmatpush3.msra.mxu1 %v2108_v18  ;;  %1657 = vmatprep.mubr.msk.f32.mxu1 %vm1884_vm7, %v1883_v4 }
 0x162   :  { %1627 = vmatprep.subr.mxu1 %v1883_v4  ;;  %1537 = vmatpush3.bf16.msra.mxu0 %v1786_v44  ;;  %v1796_v44 = vld [vmem:[#allocation3 + $0xa0] sm:$0xff]  }
 0x163   :  { %1628 = vmatpush3.msra.mxu1 %v2116_v19  ;;  %1538 = vmatprep.subr.bf16.mxu0 %v1788_v46  ;;  %v1799_v46 = vld [vmem:[#allocation3 + $0x98] sm:$0xff]  }
 0x164   :  { %1629 = vmatprep.subr.mxu1 %v1883_v4 }
 0x165   :  { %1630 = vmatpush3.msra.mxu1 %v2125_v20 }
 0x166   :  { %1631 = vmatprep.subr.mxu1 %v1883_v4  ;;  %1539 = vmatpush3.bf16.msra.mxu0 %v1789_v47  ;;  %v1800_v47 = vld [vmem:[#allocation3 + $0x50] sm:$0xff]  }
 0x167   :  { %1632 = vmatpush3.msra.mxu1 %v2132_v21  ;;  %1540 = vmatprep.subr.bf16.mxu0 %v1791_v48  ;;  %v1801_v48 = vld [vmem:[#allocation3 + $0x10] sm:$0xff]  }
 0x168   :  { %1633 = vmatprep.subr.mxu1 %v1883_v4 }
 0x169   :  { %1634 = vmatpush3.msra.mxu1 %v2139_v22 }
 0x16a   :  { %1635 = vmatprep.subr.mxu1 %v1883_v4  ;;  %1541 = vmatpush3.bf16.msra.mxu0 %v1792_v50  ;;  %v1802_v50 = vld [vmem:[#allocation3 + $0x90] sm:$0xff]  }
 0x16b   :  { %1636 = vmatpush3.msra.mxu1 %v2146_v23  ;;  %1542 = vmatprep.subr.bf16.mxu0 %v1794_v51  ;;  %v1803_v51 = vld [vmem:[#allocation3 + $0x48] sm:$0xff]  }
 0x16c   :  { %1637 = vmatprep.subr.mxu1 %v1883_v4 }
 0x16d   :  { %1638 = vmatpush3.msra.mxu1 %v2153_v25 }
 0x16e   :  { %1639 = vmatprep.subr.mxu1 %v1883_v4  ;;  %1543 = vmatpush3.bf16.msra.mxu0 %v1795_v52  ;;  %v1805_v52 = vld [vmem:[#allocation3 + $0x88] sm:$0xff]  }
 0x16f   :  { %1640 = vmatpush3.msra.mxu1 %v2160_v26  ;;  %1544 = vmatprep.subr.bf16.mxu0 %v1797_v53  ;;  %v1806_v53 = vld [vmem:[#allocation3 + $0x40] sm:$0xff]  }
 0x170   :  { %1641 = vmatprep.subr.mxu1 %v1883_v4 }
 0x171   :  { %1642 = vmatpush3.msra.mxu1 %v2167_v27 }
 0x172   :  { %1643 = vmatprep.subr.mxu1 %v1883_v4  ;;  %1545 = vmatpush3.bf16.msra.mxu0 %v1798_v54  ;;  %v1807_v54 = vld [vmem:[#allocation3] sm:$0xff]  }
 0x173   :  { %1644 = vmatpush3.msra.mxu1 %v2174_v28  ;;  %1546 = vmatprep.subr.bf16.mxu0 %v1800_v47 }
 0x174   :  { %1645 = vmatprep.subr.mxu1 %v1883_v4 }
 0x175   :  { %1646 = vmatpush3.msra.mxu1 %v2181_v29 }
 0x176   :  { %1647 = vmatprep.subr.mxu1 %v1883_v4  ;;  %1547 = vmatpush3.bf16.msra.mxu0 %v1801_v48 }
 0x177   :  { %1648 = vmatpush3.msra.mxu1 %v2188_v30  ;;  %1548 = vmatprep.subr.bf16.mxu0 %v1803_v51 }
 0x178   :  { %1649 = vmatprep.subr.mxu1 %v1883_v4 }
 0x179   :  { %1650 = vmatpush3.msra.mxu1 %v2195_v31 }
 0x17a   :  { %1651 = vmatprep.subr.mxu1 %v1883_v4 }
 0x17b   :  { %1652 = vmatpush3.msra.mxu1 %v2202_v32 }
 0x17c   :  { %1653 = vmatprep.subr.mxu1 %v1883_v4 }
 0x17d   :  { %1654 = vmatpush3.msra.mxu1 %v2211_v33 }
 0x17e   :  { %1655 = vmatprep.subr.mxu1 %v1883_v4 }
 0x17f   :  { %1656 = vmatpush3.msra.mxu1 %v2218_v35 }
 0x180   :  { %1660 = vmatprep.subr.mxu1 %v1883_v4 }
 0x21e   :  { %v404_v36 = vpop.f32.mrf.mxu0 }
 0x220   :  { %v478_v37 = vpop.f32.mrf.mxu1  ;;  %v1613_v38 = vpop.f32.mrf.mxu0 }
 0x221   :  { %v483_v39 = vrot.slane %v478_v37, 7  ;;  %v2243_v37 = vsub.s32 0, %v1956_v2 }
 0x222   :  { %v1624_v40 = vpop.f32.mrf.mxu1 }
 0x223   :  { %v486_v41 = vsel %vm485_vm9, %v404_v36, %v483_v39  ;;  %v1790_v40 = vld [vmem:[#allocation3 + $0xb0] sm:$0xff]  }
 0x224   :  { %1658 = vmatmul.mubr.f32.vlgmr.msra.gmra.mxu1 %v486_v41 }
 0x225   :  { %1662 = vmatprep.mubr.msk.f32.mxu1 %vm1884_vm7, %v1883_v4  ;;  %1661 = vmatpush3.msra.mxu1 %v2228_v42 }
 0x226   :  { %1665 = vmatprep.subr.bf16.mxu1 %v1787_v45 }
 0x2e4   :  { %v569_v56 = vpop.f32.mrf.mxu1 }
 0x2e5   :  { %v573_v57 = vmul.f32 0.001953125, %v569_v56  ;;  %v1808_v56 = vld [vmem:[#allocation3 + $0x80] sm:$0xff]  }
 0x2e6   :  { %v1659_v58 = vpop.f32.mrf.mxu1 }
 0x2e7   :  { %v574_v59 = vmul.f32 %v573_v57, %v573_v57 }
 0x2e9   :  { %v576_v60 = vrot.slane %v574_v59, 7 }
 0x2eb   :  { %v578_v61 = vsub.f32 %v573_v57, %v576_v60 }
 0x2ed   :  { %v580_v62 = vadd.f32 1e-05, %v578_v61 }
 0x2ef   :  { %1809 = vrsqrt.f32 %v580_v62 }
 0x2fc   :  { %v1810_v8 = vpop.eup %1809 }
 0x2fd   :  { %v589_v10 = vrot.slane %v1810_v8, %v2232_v6 }
 0x2ff   :  { %v590_v12 = vcombine.high %v589_v10, %v589_v10 }
 0x301   :  { %v597_v14 = vrot.slane %v590_v12, %v2232_v6 }
 0x303   :  { %v599_v15 = vmul.f32 %v597_v14, %v579_v13 }
 0x305   :  { %v601_v36 = vmul.f32 %v599_v15, %v573_v57  ;;  %v695_v57 = vsub.s32 1, %v1956_v2 }
 0x307   :  { %v602_v38 = vsub.f32 %v600_v16, %v601_v36 }
 0x309   :  { %v607_v39 = vrot.slane %v602_v38, %v2243_v37 }
 0x30b   :  { %v609_v41 = vsel %vm485_vm9, %v599_v15, %v607_v39 }
 0x30c   :  { %1663 = vmatmul.mubr.msk.f32.vlgmr.msra.gmra.mxu1 %vm611_vm10, %v609_v41 }
 0x30d   :  { %1666 = vmatpush3.bf16.msra.mxu1 %v1787_v45  ;;  %v1804_v45 = vld [vmem:[#allocation3 + $0x8] sm:$0xff]  }
 0x30e   :  { %1667 = vmatprep.subr.bf16.mxu1 %v1790_v40  ;;  %1549 = vmatpush3.bf16.msra.mxu0 %v1804_v45 }
 0x30f   :  { %1550 = vmatprep.subr.bf16.mxu0 %v1806_v53 }
 0x311   :  { %1668 = vmatpush3.bf16.msra.mxu1 %v1790_v40 }
 0x312   :  { %1669 = vmatprep.subr.bf16.mxu1 %v1793_v43  ;;  %1551 = vmatpush3.bf16.msra.mxu0 %v1807_v54 }
 0x313   :  { %1696 = vmatprep.subr.mxu0 %v1883_v4 }
 0x315   :  { %1670 = vmatpush3.bf16.msra.mxu1 %v1793_v43 }
 0x316   :  { %1671 = vmatprep.subr.bf16.mxu1 %v1796_v44 }
 0x319   :  { %1672 = vmatpush3.bf16.msra.mxu1 %v1796_v44 }
 0x31a   :  { %1673 = vmatprep.subr.bf16.mxu1 %v1799_v46 }
 0x31d   :  { %1674 = vmatpush3.bf16.msra.mxu1 %v1799_v46 }
 0x31e   :  { %1675 = vmatprep.subr.bf16.mxu1 %v1802_v50 }
 0x321   :  { %1676 = vmatpush3.bf16.msra.mxu1 %v1802_v50 }
 0x322   :  { %1677 = vmatprep.subr.bf16.mxu1 %v1805_v52 }
 0x325   :  { %1678 = vmatpush3.bf16.msra.mxu1 %v1805_v52 }
 0x326   :  { %1679 = vmatprep.subr.bf16.mxu1 %v1808_v56 }
 0x329   :  { %1680 = vmatpush3.bf16.msra.mxu1 %v1808_v56 }
 0x32a   :  { %1685 = vmatprep.subr.mxu1 %v1883_v4 }
 0x3cc   :  { %v681_v58 = vpop.f32.mrf.mxu1 }
 0x3cd   :  { %v688_v59 = vrot.slane %v681_v58, %v2243_v37  ;;  %v696_v60 = vrot.slane %v681_v58, %v695_v57 }
 0x3ce   :  { %v1664_v61 = vpop.f32.mrf.mxu1 }
 0x3cf   :  { %v689_v62 = vmul.f32 %v688_v59, %v2077_v5  ;;  %v690_v63 = vmul.f32 %v688_v59, %v2079_v7  ;;  %v691_v0 = vmul.f32 %v688_v59, %v2081_v9  ;;  %v692_v3 = vmul.f32 %v688_v59, %v2083_v11 }
 0x3d1   :  { %v699_v8 = vadd.f32 %v696_v60, %v691_v0  ;;  %v700_v10 = vadd.f32 %v696_v60, %v692_v3  ;;  %v697_v12 = vadd.f32 %v696_v60, %v689_v62  ;;  %v698_v13 = vadd.f32 %v696_v60, %v690_v63 }
 0x3d3   :  { %v703_v14 = vmax.f32 %v699_v8, 0.0  ;;  %v704_v15 = vmax.f32 %v700_v10, 0.0  ;;  %v701_v16 = vmax.f32 %v697_v12, 0.0  ;;  %v702_v36 = vmax.f32 %v698_v13, 0.0 }
 0x3d5   :  { %v708_v38 = vrot.slane %v704_v15, 7  ;;  %v720_v39 = vrot.slane %v704_v15, 1  ;;  %v705_v40 = vrot.slane %v701_v16, 7  ;;  %v706_v41 = vrot.slane %v702_v36, 7 }
 0x3d6   :  { %v730_v43 = vpack.c.bf16 %v702_v36, %v701_v16  ;;  %v717_v5 = vrot.slane %v701_v16, 1  ;;  %v718_v44 = vrot.slane %v702_v36, 1  ;;  %v719_v7 = vrot.slane %v703_v14, 1 }
 0x3d7   :  { %v711_v9 = vsel %vm120_vm1, %v705_v40, %v706_v41  ;;  %v712_v11 = vsel %vm120_vm1, %v708_v38, %v705_v40  ;;  %v733_v45 = vpack.c.bf16 %v704_v15, %v703_v14  ;;  %v707_v52 = vrot.slane %v703_v14, 7 }
 0x3d8   :  { %959 = vmatprep.mubr.bf16.mxu0 %v730_v43  ;;  %v1493_v46 = vpack.c.bf16 %v711_v9, %v712_v11  ;;  %v722_v47 = vsel %vm141_vm0, %v718_v44, %v719_v7  ;;  %v723_v48 = vsel %vm141_vm0, %v717_v5, %v718_v44  ;;  %v721_v50 = vsel %vm141_vm0, %v719_v7, %v720_v39  ;;  %v1270_v44 = vld [vmem:[%s2391_s6] sm:$0x1]  ;;  %s1889_s6 = smov [#allocation6]  }
 0x3d9   :  { %v1499_v51 = vpack.c.bf16 %v722_v47, %v723_v48  ;;  %v724_v49 = vsel %vm141_vm0, %v720_v39, %v717_v5  ;;  %v709_v24 = vsel %vm120_vm1, %v707_v52, %v708_v38  ;;  %v710_v54 = vsel %vm120_vm1, %v706_v41, %v707_v52  ;;  %s1423_s22 = sshll.u32 %s1889_s6, 4  ;;  %s1424_s22 = int_to_ptr.vmem [resolvable:$true] %s1423_s22 }
 0x3da   :  { %1494 = vmatmul.mubr.msk.bf16.vlgmr.msra.gmra.mxu0 %vm1492_vm12, %v1493_v46  ;;  %v1502_v53 = vpack.c.bf16 %v724_v49, %v721_v50  ;;  %v1496_v34 = vpack.c.bf16 %v709_v24, %v710_v54  ;;  %s1833_s24 = scalar_lea.vmem %s1424_s22, 256  ;;  %p1838_p6 = scmp.lt.s32.totalorder %s1424_s22, %s1424_s22 }
 0x3db   :  { %1681 = vmatprep.mubr.msk.bf16.mxu1 %vm1498_vm13, %v1499_v51  ;;  %967 = vmatprep.mubr.bf16.mxu0 %v733_v45  ;;  %p1834_p5 = scmp.ne.s32.totalorder %s1424_s22, %s1833_s24  ;;  %p1839_p7 = scmp.lt.s32.totalorder %s1833_s24, %s1833_s24 }
 0x3dc   :  { %1682 = vmatmul.mubr.msk.bf16.vlgmr.msra.gmra.mxu1 %vm1501_vm14, %v1502_v53 }
 0x3dd   :  { %1693 = vmatprep.mubr.msk.f32.mxu1 %vm1884_vm7, %v1883_v4  ;;  %p1840_p8 = por %p1839_p7, %p1838_p6 }
 0x3df   :  { %p1841_p9 = pnand %p1840_p8, %p1834_p5 }
 0x3e2   :  { %1497 = vmatmul.mubr.msk.bf16.gmra.mxu0 %vm1495_vm15, %v1496_v34 }
 0x3e3   :  { %1704 = vmatprep.mubr.msk.f32.mxu0 %vm1884_vm7, %v1883_v4 }
 0x49a   :  { %v1552_v56 = vpop.f32.mrf.mxu0 }
 0x49c   :  { %v1553_v58 = vpop.f32.mrf.mxu0  ;;  %v1683_v59 = vpop.f32.mrf.mxu1 }
 0x49d   :  { %v1554_v15 = vadd.f32 %v1553_v58, %v1552_v56 }
 0x49e   :  { %v1555_v60 = vpop.f32.mrf.mxu0  ;;  %v1010_v62 = vpop.f32.mrf.mxu1 }
 0x49f   :  { %v2300_v40 = vadd.f32 %v1554_v15, %v1010_v62 }
 0x4a0   :  { %v1556_v61 = vpop.f32.mrf.mxu0  ;;  %v1684_v3 = vpop.f32.mrf.mxu1 }
 0x4a1   :  { %v1557_v55 = vadd.f32 %v1556_v61, %v1555_v60  ;;  %v1095_v5 = vmul.f32 %v2300_v40, %v2300_v40 }
 0x4a2   :  { %v1558_v63 = vpop.f32.mrf.mxu0  ;;  %v1013_v14 = vpop.f32.mrf.mxu1 }
 0x4a3   :  { %v2294_v38 = vadd.f32 %v1557_v55, %v1013_v14 }
 0x4a4   :  { %v1559_v0 = vpop.f32.mrf.mxu0 }
 0x4a5   :  { %v1560_v10 = vadd.f32 %v1559_v0, %v1558_v63  ;;  %v1096_v43 = vmul.f32 %v2294_v38, %v2294_v38 }
 0x4a6   :  { %v1561_v8 = vpop.f32.mrf.mxu0 }
 0x4a7   :  { %v2290_v16 = vadd.f32 %v1683_v59, %v1560_v10 }
 0x4a8   :  { %v1562_v12 = vpop.f32.mrf.mxu0 }
 0x4a9   :  { %v1563_v13 = vadd.f32 %v1562_v12, %v1561_v8  ;;  %v1097_v41 = vmul.f32 %v2290_v16, %v2290_v16 }
 0x4ab   :  { %v2292_v36 = vadd.f32 %v1684_v3, %v1563_v13 }
 0x4ad   :  { %v1098_v39 = vmul.f32 %v2292_v36, %v2292_v36  ;;  %1686 = vmatpush3.msra.mxu1 %v2292_v36 }
 0x4ae   :  { %1687 = vmatprep.subr.mxu1 %v1883_v4 }
 0x4af   :  { %1688 = vmatpush3.msra.mxu1 %v2290_v16  ;;  %1697 = vmatpush3.msra.mxu0 %v1098_v39 }
 0x4b0   :  { %1689 = vmatprep.subr.mxu1 %v1883_v4  ;;  %1698 = vmatprep.subr.mxu0 %v1883_v4 }
 0x4b1   :  { %1690 = vmatpush3.msra.mxu1 %v2294_v38  ;;  %1699 = vmatpush3.msra.mxu0 %v1097_v41 }
 0x4b2   :  { %1691 = vmatprep.subr.mxu1 %v1883_v4  ;;  %1700 = vmatprep.subr.mxu0 %v1883_v4 }
 0x4b3   :  { %1692 = vmatpush3.msra.mxu1 %v2300_v40  ;;  %1701 = vmatpush3.msra.mxu0 %v1096_v43 }
 0x4b4   :  { %1702 = vmatprep.subr.mxu0 %v1883_v4  ;;  %1694 = vmatmul.mubr.msk.f32.vlgmr.msra.gmra.mxu1 %vm334_vm8, %v1885_v17 }
 0x4b5   :  { %1703 = vmatpush3.msra.mxu0 %v1095_v5  ;;  %1707 = vmatprep.subr.mxu1 %v1883_v4 }
 0x4b6   :  { %1705 = vmatmul.mubr.msk.f32.vlgmr.msra.gmra.mxu0 %vm334_vm8, %v1885_v17  ;;  %1708 = vmatpush3.msra.mxu1 %v2108_v18 }
 0x4b7   :  { %1709 = vmatprep.subr.mxu1 %v1883_v4  ;;  %1739 = vmatprep.mubr.msk.f32.mxu1 %vm1884_vm7, %v1883_v4 }
 0x4b8   :  { %1710 = vmatpush3.msra.mxu1 %v2116_v19  ;;  %1742 = vmatprep.subr.mxu0 %v1883_v4 }
 0x4b9   :  { %1711 = vmatprep.subr.mxu1 %v1883_v4  ;;  %1743 = vmatpush3.msra.mxu0 %v2228_v42 }
 0x4ba   :  { %1712 = vmatpush3.msra.mxu1 %v2125_v20  ;;  %1744 = vmatprep.mubr.msk.f32.mxu0 %vm1884_vm7, %v1883_v4 }
 0x4bb   :  { %1713 = vmatprep.subr.mxu1 %v1883_v4 }
 0x4bc   :  { %1714 = vmatpush3.msra.mxu1 %v2132_v21 }
 0x4bd   :  { %1715 = vmatprep.subr.mxu1 %v1883_v4 }
 0x4be   :  { %1716 = vmatpush3.msra.mxu1 %v2139_v22 }
 0x4bf   :  { %1717 = vmatprep.subr.mxu1 %v1883_v4 }
 0x4c0   :  { %1718 = vmatpush3.msra.mxu1 %v2146_v23 }
 0x4c1   :  { %1719 = vmatprep.subr.mxu1 %v1883_v4 }
 0x4c2   :  { %1720 = vmatpush3.msra.mxu1 %v2153_v25 }
 0x4c3   :  { %1721 = vmatprep.subr.mxu1 %v1883_v4 }
 0x4c4   :  { %1722 = vmatpush3.msra.mxu1 %v2160_v26 }
 0x4c5   :  { %1723 = vmatprep.subr.mxu1 %v1883_v4 }
 0x4c6   :  { %1724 = vmatpush3.msra.mxu1 %v2167_v27 }
 0x4c7   :  { %1725 = vmatprep.subr.mxu1 %v1883_v4 }
 0x4c8   :  { %1726 = vmatpush3.msra.mxu1 %v2174_v28 }
 0x4c9   :  { %1727 = vmatprep.subr.mxu1 %v1883_v4 }
 0x4ca   :  { %1728 = vmatpush3.msra.mxu1 %v2181_v29 }
 0x4cb   :  { %1729 = vmatprep.subr.mxu1 %v1883_v4 }
 0x4cc   :  { %1730 = vmatpush3.msra.mxu1 %v2188_v30 }
 0x4cd   :  { %1731 = vmatprep.subr.mxu1 %v1883_v4 }
 0x4ce   :  { %1732 = vmatpush3.msra.mxu1 %v2195_v31 }
 0x4cf   :  { %1733 = vmatprep.subr.mxu1 %v1883_v4 }
 0x4d0   :  { %1734 = vmatpush3.msra.mxu1 %v2202_v32 }
 0x4d1   :  { %1735 = vmatprep.subr.mxu1 %v1883_v4 }
 0x4d2   :  { %1736 = vmatpush3.msra.mxu1 %v2211_v33  ;;  %v1249_v33 = vld [vmem:[%s2390_s5] sm:$0x1]  ;;  %s1888_s5 = smov 127  }
 0x4d3   :  { %1737 = vmatprep.subr.mxu1 %v1883_v4 }
 0x4d4   :  { %1738 = vmatpush3.msra.mxu1 %v2218_v35 }
 0x574   :  { %v1091_v17 = vpop.f32.mrf.mxu1 }
 0x576   :  { %v1165_v18 = vpop.f32.mrf.mxu0  ;;  %v1695_v19 = vpop.f32.mrf.mxu1 }
 0x577   :  { %v1170_v20 = vrot.slane %v1165_v18, 7 }
 0x578   :  { %v1706_v21 = vpop.f32.mrf.mxu0 }
 0x579   :  { %v1172_v22 = vsel %vm485_vm9, %v1091_v17, %v1170_v20 }
 0x57a   :  { %1740 = vmatmul.mubr.f32.vlgmr.msra.gmra.mxu1 %v1172_v22 }
 0x63a   :  { %v1239_v23 = vpop.f32.mrf.mxu1 }
 0x63b   :  { %v1243_v25 = vmul.f32 0.001953125, %v1239_v23 }
 0x63c   :  { %v1741_v26 = vpop.f32.mrf.mxu1 }
 0x63d   :  { %v1244_v27 = vmul.f32 %v1243_v25, %v1243_v25 }
 0x63f   :  { %v1246_v28 = vrot.slane %v1244_v27, 7 }
 0x641   :  { %v1248_v29 = vsub.f32 %v1243_v25, %v1246_v28 }
 0x643   :  { %v1250_v30 = vadd.f32 1e-05, %v1248_v29 }
 0x645   :  { %1811 = vrsqrt.f32 %v1250_v30 }
 0x652   :  { %v1812_v31 = vpop.eup %1811 }
 0x653   :  { %v1259_v4 = vrot.slane %v1812_v31, %v2232_v6 }
 0x655   :  { %v1260_v32 = vcombine.high %v1259_v4, %v1259_v4 }
 0x657   :  { %v1267_v35 = vrot.slane %v1260_v32, %v2232_v6 }
 0x659   :  { %v1269_v42 = vmul.f32 %v1267_v35, %v1249_v33 }
 0x65b   :  { %v1271_v7 = vmul.f32 %v1269_v42, %v1243_v25 }
 0x65d   :  { %v1272_v9 = vsub.f32 %v1270_v44, %v1271_v7 }
 0x65f   :  { %v1277_v11 = vrot.slane %v1272_v9, %v2243_v37 }
 0x661   :  { %v1279_v46 = vsel %vm485_vm9, %v1269_v42, %v1277_v11 }
 0x662   :  { %1745 = vmatmul.mubr.msk.f32.vlgmr.msra.gmra.mxu0 %vm611_vm10, %v1279_v46 }
 0x722   :  { %v1349_v47 = vpop.f32.mrf.mxu0 }
 0x723   :  { %v1356_v48 = vrot.slane %v1349_v47, %v2243_v37  ;;  %v1364_v50 = vrot.slane %v1349_v47, %v695_v57 }
 0x724   :  { %v1746_v6 = vpop.f32.mrf.mxu0 }
 0x725   :  { %v1357_v51 = vmul.f32 %v1356_v48, %v2300_v40  ;;  %v1358_v45 = vmul.f32 %v1356_v48, %v2294_v38  ;;  %v1359_v49 = vmul.f32 %v1356_v48, %v2290_v16  ;;  %v1360_v52 = vmul.f32 %v1356_v48, %v2292_v36 }
 0x727   :  { %v1365_v53 = vadd.f32 %v1364_v50, %v1357_v51  ;;  %v1366_v24 = vadd.f32 %v1364_v50, %v1358_v45  ;;  %v1367_v54 = vadd.f32 %v1364_v50, %v1359_v49  ;;  %v1368_v34 = vadd.f32 %v1364_v50, %v1360_v52 }
 0x729   :  { %v1369_v56 = vmax.f32 %v1365_v53, 0.0  ;;  %v1370_v58 = vmax.f32 %v1366_v24, 0.0  ;;  %v1371_v59 = vmax.f32 %v1367_v54, 0.0  ;;  %v1372_v37 = vmax.f32 %v1368_v34, 0.0 }
 0x72b   :  { %1373 = vst [vmem:[#allocation2] sm:$0xff] %v1369_v56  ;;  %1374 = vst [vmem:[#allocation2 + $0x8] sm:$0xff] %v1370_v58 }
 0x72c   :  { %1375 = vst [vmem:[#allocation2 + $0x10] sm:$0xff] %v1371_v59  ;;  %1376 = vst [vmem:[#allocation2 + $0x18] sm:$0xff] %v1372_v37 }
 0x732   :  { %v1381_v2 = vld [vmem:[#allocation2 + $0x1] ss:$2 sm:$0xff]  ;;  %v1377_v57 = vld [vmem:[#allocation2] ss:$2 sm:$0xff] }
 0x733   :  { %1400 = vrot.lane.b32.xlu0 %v1381_v2, %s1888_s5  ;;  %1384 = vrot.lane.b32.xlu1 %v1377_v57, %s1888_s5  ;;  %v1379_v60 = vld [vmem:[#allocation2 + $0x10] ss:$2 sm:$0xff]  ;;  %v1383_v61 = vld [vmem:[#allocation2 + $0x11] ss:$2 sm:$0xff] }
 0x737   :  { %1386 = vrot.lane.b32.xlu1 %v1379_v60, %s1888_s5 }
 0x73b   :  { %1402 = vrot.lane.b32.xlu1 %v1383_v61, %s1888_s5 }
 0x7a5   :  { %v1385_v62 = vpop.permute.xlu1 %1384  ;;  %v1401_v3 = vpop.permute.xlu0 %1400 }
 0x7a6   :  { %vm1388_vm0 = vcmp.gt.f32.partialorder %v1385_v62, %v1377_v57 }
 0x7a7   :  { %v1390_v63 = vsel %vm1388_vm0, %v1385_v62, %v1377_v57  ;;  %v1392_v0 = vsel %vm1388_vm0, 1, %v1882_v1 }
 0x7a8   :  { %vm1394_vm1 = vcmp.gt.f32.partialorder %v1381_v2, %v1390_v63 }
 0x7a9   :  { %v1396_v8 = vsel %vm1394_vm1, %v1381_v2, %v1390_v63  ;;  %v1398_v10 = vsel %vm1394_vm1, 2, %v1392_v0  ;;  %v1387_v12 = vpop.permute.xlu1 %1386 }
 0x7aa   :  { %vm1404_vm2 = vcmp.gt.f32.partialorder %v1401_v3, %v1396_v8  ;;  %vm1389_vm3 = vcmp.gt.f32.partialorder %v1387_v12, %v1379_v60 }
 0x7ab   :  { %v1406_v55 = vsel %vm1404_vm2, %v1401_v3, %v1396_v8  ;;  %v1408_v13 = vsel %vm1404_vm2, 3, %v1398_v10  ;;  %v1391_v14 = vsel %vm1389_vm3, %v1387_v12, %v1379_v60  ;;  %v1393_v15 = vsel %vm1389_vm3, 1, %v1882_v1 }
 0x7ac   :  { %1410 = vst [vmem:[#allocation6] sm:$0xff] %v1406_v55  ;;  %v1412_v16 = vpack.c.b16 %v1408_v13, %v1408_v13  ;;  %vm1395_vm4 = vcmp.gt.f32.partialorder %v1383_v61, %v1391_v14 }
 0x7ad   :  { %v1397_v36 = vsel %vm1395_vm4, %v1383_v61, %v1391_v14  ;;  %v1399_v38 = vsel %vm1395_vm4, 2, %v1393_v15  ;;  %v1403_v39 = vpop.permute.xlu1 %1402 }
 0x7ae   :  { %v1413_v40 = vpack.c.b8 %v1412_v16, %v1412_v16  ;;  %vm1405_vm5 = vcmp.gt.f32.partialorder %v1403_v39, %v1397_v36 }
 0x7af   :  { %v1407_v41 = vsel %vm1405_vm5, %v1403_v39, %v1397_v36  ;;  %v1409_v43 = vsel %vm1405_vm5, 3, %v1399_v38 }
 0x7b0   :  { %1416 = vst [vmem:[#allocation7] sm:$0x3] %v1413_v40  ;;  %1411 = vst [vmem:[#allocation6 + $0x8] sm:$0xff] %v1407_v41  ;;  %v1414_v5 = vpack.c.b16 %v1409_v43, %v1409_v43 }
 0x7b1   :  { %1844 = shalt.err (!%p1841_p9)
}
 0x7b2   :  { %s1891_s25 = smov 128   ;;  %s1892_s26 = smov 8   ;;  %v1415_v1 = vpack.c.b8 %v1414_v5, %v1414_v5 }
 0x7b3   :  { %1429 = dma.vmem_to_hbm [thread:$0]  %s1424_s22, 256, %s2394_s9, [#allocation5], %s1891_s25, %s1891_s25, %s1892_s26  }
 0x7b4   :  { %1417 = vst [vmem:[#allocation7 + $0x2] sm:$0x3] %v1415_v1  ;;  %s1853_s1 = scalar_lea.vmem %s1436_s23, 64  ;;  %p1858_p11 = scmp.lt.s32.totalorder %s1436_s23, %s1436_s23 }
 0x7b5   :  { %p1854_p10 = scmp.ne.s32.totalorder %s1436_s23, %s1853_s1  ;;  %p1859_p12 = scmp.lt.s32.totalorder %s1853_s1, %s1853_s1 }
 0x7b7   :  { %p1860_p13 = por %p1859_p12, %p1858_p11 }
 0x7b9   :  { %p1861_p0 = pnand %p1860_p13, %p1854_p10 }
 0x7bb   :  { %1864 = shalt.err (!%p1861_p0)
}
 0x7bc   :  { %s1893_s29 = smov 32   ;;  %s1894_s30 = smov 2  }
 0x7bd   :  { %1441 = dma.vmem_to_hbm [thread:$0]  %s1436_s23, 64, %s2395_s10, [#allocation8], %s1893_s29, %s1893_s29, %s1894_s30  }
 0x7be   :  { %1875 = dma.done.wait [#allocation5], 256  }
 0x7bf   :  { %1876 = vsyncadd [#allocation5], 4294967040 }
 0x7c0   :  { %1877 = dma.done.wait [#allocation8], 64  }
 0x7c1   :  { %1878 = vsyncadd [#allocation8], 4294967232 }
 0x7c2   :  { %1448 = vsyncpa [#allocation4], 1 }
 0x7c3   :  { %1449 = vsyncpa [#allocation5], 1 }
 0x7c4   :  { %1450 = vsyncpa [#allocation8], 1 }

</bundles_post_ra>
